<compile_context>
chip_gen: v5e
topology: v5e:2x2
jax: 0.10.0
libtpu: 0.0.40
codegen_flags: <defaults>
</compile_context>

<pallas_src>
import functools
import math

import jax
import jax.numpy as jnp
from jax import lax
from jax.experimental import pallas as pl
from jax.experimental.pallas import tpu as pltpu


def _round_up(x, m):
    return (x + m - 1) // m * m


def _choose_blocks(seq_len, block_q, block_k):
    """Clamp (block_q, block_k) to the sequence; keep block_k | block_q."""
    s8 = _round_up(seq_len, 8)
    bq = min(_round_up(block_q, 8), s8)
    bk = min(_round_up(block_k, 8), bq)
    if bq % bk != 0:           # fall back to a single shared tile size
        bk = bq
    return bq, bk


# ----------------------------------------------------------------------------
# Parameter fusion (do once, amortized across calls).
# ----------------------------------------------------------------------------
def fuse_qkv_params(wq, bq, wk, bk, wv, bv):
    """Pad to lane width, fold 1/sqrt(D) into the q projection, fuse q/k/v."""
    D = wq.shape[0]
    Dp = _round_up(D, 128)
    scale = 1.0 / math.sqrt(D)

    def pad_w(w):
        return jnp.pad(w, ((0, Dp - D), (0, Dp - D)))

    def pad_b(b):
        return jnp.pad(b, (0, Dp - D))

    w_fused = jnp.concatenate(
        [pad_w(wq * scale), pad_w(wk), pad_w(wv)], axis=1).astype(jnp.bfloat16)
    b_fused = jnp.concatenate(
        [pad_b(bq * scale), pad_b(bk), pad_b(bv)]
    ).astype(jnp.float32).reshape(1, 3 * Dp)
    return w_fused, b_fused


# ----------------------------------------------------------------------------
# Kernel 1: fused QKV projection.  One bf16 matmul with 3x-wide N, f32 acc.
# ----------------------------------------------------------------------------
def _qkv_proj_kernel(x_ref, w_ref, b_ref, q_ref, k_ref, v_ref):
    # x_ref: (1, blk, Dp) f32 (cast here, on the VPU); w_ref: (Dp, 3Dp) bf16.
    x = x_ref[0].astype(jnp.bfloat16)
    acc = jnp.dot(x, w_ref[...], preferred_element_type=jnp.float32)
    acc = acc + b_ref[...]                      # f32 bias add
    dp = q_ref.shape[-1]                        # lane-aligned multiple of 128
    q_ref[0] = acc[:, :dp].astype(q_ref.dtype)
    k_ref[0] = acc[:, dp:2 * dp].astype(k_ref.dtype)
    v_ref[0] = acc[:, 2 * dp:].astype(v_ref.dtype)


def _build_qkv_call(B, Sp, Dp, blk, vmem_limit_bytes, proj_cost,
                    single_buffer_weights):
    def const_spec(shape):
        if single_buffer_weights:
            # Resident operand (constant index_map): second pipeline buffer is
            # pure VMEM waste, request single-buffering.
            return pl.BlockSpec(shape, lambda b, i: (0, 0),
                                pipeline_mode=pl.Buffered(1))
        return pl.BlockSpec(shape, lambda b, i: (0, 0))

    qkv_shape = jax.ShapeDtypeStruct((B, Sp, Dp), jnp.bfloat16)
    return pl.pallas_call(
        _qkv_proj_kernel,
        out_shape=(qkv_shape, qkv_shape, qkv_shape),
        grid_spec=pltpu.PrefetchScalarGridSpec(
            num_scalar_prefetch=0,
            grid=(B, Sp // blk),
            in_specs=[
                pl.BlockSpec((1, blk, Dp), lambda b, i: (b, i, 0)),   # x
                const_spec((Dp, 3 * Dp)),                             # W_qkv
                const_spec((1, 3 * Dp)),                              # b_qkv
            ],
            out_specs=[
                pl.BlockSpec((1, blk, Dp), lambda b, i: (b, i, 0)),
                pl.BlockSpec((1, blk, Dp), lambda b, i: (b, i, 0)),
                pl.BlockSpec((1, blk, Dp), lambda b, i: (b, i, 0)),
            ],
        ),
        compiler_params=pltpu.CompilerParams(
            dimension_semantics=("parallel", "parallel"),
            vmem_limit_bytes=vmem_limit_bytes),
        cost_estimate=proj_cost,
    )


# ----------------------------------------------------------------------------
# Kernel 2: flash attention (online softmax) over kv tiles.
# ----------------------------------------------------------------------------
def _flash_attn_kernel(q_ref, k_ref, v_ref, o_ref, m_ref, l_ref, acc_ref,
                       *, seq_len, seq_padded, block_k):
    ki = pl.program_id(2)

    @pl.when(ki == 0)
    def _init():
        m_ref[...] = jnp.full(m_ref.shape, -jnp.inf, dtype=m_ref.dtype)
        l_ref[...] = jnp.zeros(l_ref.shape, dtype=l_ref.dtype)
        acc_ref[...] = jnp.zeros(acc_ref.shape, dtype=acc_ref.dtype)

    q = q_ref[0]                               # (blk_q, Dp) bf16, pre-scaled
    k = k_ref[0]                               # (blk_k, Dp) bf16
    v = v_ref[0]                               # (blk_k, Dp) bf16

    # Contract last dims of q and k directly -> no k.T / XLU transpose.
    s = lax.dot_general(q, k, (((1,), (1,)), ((), ())),
                        preferred_element_type=jnp.float32)  # (blk_q, blk_k)

    # Mask zero-padded kv columns (static: only emitted when Sp != S).
    # Padding is at the tail, so kv tile 0 always has valid columns; the
    # running max is therefore finite before any fully-masked tile, and those
    # tiles contribute exactly 0 (exp(-1e30 - m) underflows).
    if seq_padded != seq_len:
        kv_idx = ki * block_k + lax.broadcasted_iota(jnp.int32, s.shape, 1)
        s = jnp.where(kv_idx < seq_len, s, -1e30)

    # Online softmax update (all f32).
    m_prev = m_ref[...]
    m_new = jnp.maximum(m_prev, jnp.max(s, axis=-1, keepdims=True))
    alpha = jnp.exp(m_prev - m_new)
    p = jnp.exp(s - m_new)
    l_ref[...] = alpha * l_ref[...] + jnp.sum(p, axis=-1, keepdims=True)
    acc_ref[...] = alpha * acc_ref[...] + jnp.dot(
        p.astype(v.dtype), v, preferred_element_type=jnp.float32)
    m_ref[...] = m_new

    @pl.when(ki == pl.num_programs(2) - 1)
    def _finalize():
        # approx reciprocal (EUP) is within the bf16-dominated error budget.
        inv_l = pl.reciprocal(l_ref[...], approx=True)
        o_ref[0] = (acc_ref[...] * inv_l).astype(o_ref.dtype)


# ----------------------------------------------------------------------------
# Wrapper
# ----------------------------------------------------------------------------
def temporal_attention(x, w_fused, b_fused, *, block_q=512, block_k=256,
                       vmem_limit_bytes=48 * 1024 * 1024):
    """x: (B, S, D).  w_fused/b_fused from fuse_qkv_params.  Returns (B, S, D).

    block_k=256 targets the 256-wide MXUs of v6e/v7x; use block_k=128 on v5e.
    """
    B, S, D = x.shape
    out_dtype = x.dtype
    Dp = w_fused.shape[0]
    assert Dp == _round_up(D, 128) and w_fused.shape[1] == 3 * Dp

    blk_q, blk_k = _choose_blocks(S, block_q, block_k)
    Sp = _round_up(S, blk_q)                     # multiple of blk_k too
    n_q = Sp // blk_q
    n_kv = Sp // blk_k

    # Pad only when needed; keep x in its original dtype (cast to bf16 happens
    # inside the projection kernel on the VPU -> no extra HBM round trip).
    # Padded q rows are computed against real K/V and dropped by the final
    # slice; padded kv rows are masked inside the attention kernel.
    if Sp != S or Dp != D:
        x_p = jnp.pad(x, ((0, 0), (0, Sp - S), (0, Dp - D)))
    else:
        x_p = x

    # ---- fused QKV projection ----------------------------------------------
    proj_cost = pl.CostEstimate(
        flops=2 * B * Sp * Dp * 3 * Dp,
        transcendentals=0,
        bytes_accessed=(B * Sp * Dp * jnp.dtype(x_p.dtype).itemsize
                        + w_fused.size * 2 + b_fused.size * 4
                        + 3 * B * Sp * Dp * 2),
    )
    try:
        q, k, v = _build_qkv_call(B, Sp, Dp, blk_q, vmem_limit_bytes,
                                  proj_cost, single_buffer_weights=True
                                  )(x_p, w_fused, b_fused)
    except Exception:
        # TODO(synk): pl.Buffered(1) single-buffering rejected by this jax
        # build; fall back to default double-buffered weight spec.
        q, k, v = _build_qkv_call(B, Sp, Dp, blk_q, vmem_limit_bytes,
                                  proj_cost, single_buffer_weights=False
                                  )(x_p, w_fused, b_fused)

    # ---- flash attention -----------------------------------------------------
    out_itemsize = jnp.dtype(out_dtype).itemsize
    attn_cost = pl.CostEstimate(
        flops=2 * 2 * B * Sp * Sp * Dp,                  # QK^T + PV
        transcendentals=B * Sp * Sp,                     # exp
        bytes_accessed=(B * Sp * Dp * 2                  # q read once
                        + 2 * n_q * B * Sp * Dp * 2      # k, v re-streamed/q-tile
                        + B * Sp * Dp * out_itemsize),
    )
    kernel = functools.partial(_flash_attn_kernel,
                               seq_len=S, seq_padded=Sp, block_k=blk_k)
    out_p = pl.pallas_call(
        kernel,
        out_shape=jax.ShapeDtypeStruct((B, Sp, Dp), out_dtype),
        grid_spec=pltpu.PrefetchScalarGridSpec(
            num_scalar_prefetch=0,
            grid=(B, n_q, n_kv),
            in_specs=[
                pl.BlockSpec((1, blk_q, Dp), lambda b, qi, ki: (b, qi, 0)),  # q
                pl.BlockSpec((1, blk_k, Dp), lambda b, qi, ki: (b, ki, 0)),  # k
                pl.BlockSpec((1, blk_k, Dp), lambda b, qi, ki: (b, ki, 0)),  # v
            ],
            out_specs=pl.BlockSpec((1, blk_q, Dp), lambda b, qi, ki: (b, qi, 0)),
            scratch_shapes=[
                pltpu.VMEM((blk_q, 1), jnp.float32),    # running max   m
                pltpu.VMEM((blk_q, 1), jnp.float32),    # running denom l
                pltpu.VMEM((blk_q, Dp), jnp.float32),   # output accumulator
            ],
        ),
        compiler_params=pltpu.CompilerParams(
            dimension_semantics=("parallel", "parallel", "arbitrary"),
            vmem_limit_bytes=vmem_limit_bytes),
        cost_estimate=attn_cost,
    )(q, k, v)

    if Sp != S or Dp != D:
        out_p = out_p[:, :S, :D]
    return out_p


# ----------------------------------------------------------------------------
# Pure-JAX reference (f32) matching the PyTorch module.
# ----------------------------------------------------------------------------
def _reference(x, wq, bq, wk, bk, wv, bv):
    q = x @ wq + bq
    k = x @ wk + bk
    v = x @ wv + bv
    scores = jnp.einsum("bqd,bkd->bqk", q, k) / math.sqrt(x.shape[-1])
    attn = jax.nn.softmax(scores, axis=-1)
    return jnp.einsum("bqk,bkd->bqd", attn, v)


if __name__ == "__main__":
    def run_case(key, B, S, D):
        kx, kwq, kbq, kwk, kbk, kwv, kbv = jax.random.split(key, 7)
        x = jax.random.normal(kx, (B, S, D), dtype=jnp.float32)
        bound = 1.0 / math.sqrt(D)
        init = lambda k, shape: jax.random.uniform(
            k, shape, dtype=jnp.float32, minval=-bound, maxval=bound)
        wq, bq = init(kwq, (D, D)), init(kbq, (D,))
        wk, bk = init(kwk, (D, D)), init(kbk, (D,))
        wv, bv = init(kwv, (D, D)), init(kbv, (D,))

        w_fused, b_fused = fuse_qkv_params(wq, bq, wk, bk, wv, bv)
        out = jax.block_until_ready(temporal_attention(x, w_fused, b_fused))
        ref = _reference(x, wq, bq, wk, bk, wv, bv)

        assert out.shape == (B, S, D)
        assert bool(jnp.all(jnp.isfinite(out)))
        err = float(jnp.max(jnp.abs(out - ref)))
        assert jnp.allclose(out, ref, atol=3e-2, rtol=3e-2), (
            f"mismatch vs reference at B={B} S={S} D={D}: max abs err {err}")

    root = jax.random.PRNGKey(0)
    k_small, k_mid, k_big = jax.random.split(root, 3)
    # Module-implied small shapes (exercises S/D padding on the lane axis).
    run_case(k_small, 2, 8, 32)
    # Single-tile path, no sequence padding (blk_q = blk_k = S).
    run_case(k_mid, 2, 320, 128)
    # Multi-tile online-softmax path with blk_q=512 / blk_k=256, a partially
    # masked kv tile and a fully masked trailing kv tile.
    run_case(k_big, 2, 700, 128)

    print("KERNEL_OK")
</pallas_src>

<mosaic_0001>
module attributes {stable_mosaic.version = 11 : i64} {
  func.func @_qkv_proj_kernel(%arg0: i32, %arg1: i32, %arg2: memref<1x8x128xf32, #tpu.memory_space<vmem>>, %arg3: memref<128x384xbf16, #tpu.memory_space<vmem>>, %arg4: memref<1x384xf32, #tpu.memory_space<vmem>>, %arg5: memref<1x8x128xbf16, #tpu.memory_space<vmem>>, %arg6: memref<1x8x128xbf16, #tpu.memory_space<vmem>>, %arg7: memref<1x8x128xbf16, #tpu.memory_space<vmem>>) attributes {dimension_semantics = [#tpu.dimension_semantics<parallel>, #tpu.dimension_semantics<parallel>], iteration_bounds = array<i64: 2, 1>, scalar_prefetch = 0 : i64, scratch_operands = 0 : i64, tpu.core_type = #tpu.core_type<tc>, window_params = [{transform_indices = @transform_0, window_bounds = array<i64: 1, 8, 128>}, {pipeline_mode = #tpu.pipeline_mode<synchronous>, transform_indices = @transform_1, window_bounds = array<i64: 128, 384>}, {pipeline_mode = #tpu.pipeline_mode<synchronous>, transform_indices = @transform_2, window_bounds = array<i64: 1, 384>}, {transform_indices = @transform_3, window_bounds = array<i64: 1, 8, 128>}, {transform_indices = @transform_4, window_bounds = array<i64: 1, 8, 128>}, {transform_indices = @transform_5, window_bounds = array<i64: 1, 8, 128>}]} {
    %c0 = arith.constant 0 : index
    %c0_0 = arith.constant 0 : index
    %c0_1 = arith.constant 0 : index
    %0 = vector.load %arg2[%c0, %c0_0, %c0_1] : memref<1x8x128xf32, #tpu.memory_space<vmem>>, vector<1x8x128xf32>
    %1 = vector.shape_cast %0 : vector<1x8x128xf32> to vector<8x128xf32>
    %2 = arith.truncf %1 : vector<8x128xf32> to vector<8x128xbf16>
    %c0_2 = arith.constant 0 : index
    %c0_3 = arith.constant 0 : index
    %3 = vector.load %arg3[%c0_2, %c0_3] : memref<128x384xbf16, #tpu.memory_space<vmem>>, vector<128x384xbf16>
    %cst = arith.constant dense<0.000000e+00> : vector<8x384xf32>
    %4 = tpu.matmul %2, %3, %cst {dimension_numbers = #tpu.dot_dimension_numbers<[1], [0], [0], [1], [0, 0, 1, 1], [], []>} : vector<8x128xbf16>, vector<128x384xbf16>, vector<8x384xf32> -> vector<8x384xf32>
    %c0_4 = arith.constant 0 : index
    %c0_5 = arith.constant 0 : index
    %5 = vector.load %arg4[%c0_4, %c0_5] : memref<1x384xf32, #tpu.memory_space<vmem>>, vector<1x384xf32>
    %6 = vector.broadcast %5 : vector<1x384xf32> to vector<8x384xf32>
    %7 = arith.addf %4, %6 : vector<8x384xf32>
    %8 = vector.extract_strided_slice %7 {offsets = [0, 0], sizes = [8, 128], strides = [1, 1]} : vector<8x384xf32> to vector<8x128xf32>
    %9 = arith.truncf %8 : vector<8x128xf32> to vector<8x128xbf16>
    %c0_6 = arith.constant 0 : index
    %c0_7 = arith.constant 0 : index
    %c0_8 = arith.constant 0 : index
    %10 = vector.load %arg5[%c0_6, %c0_7, %c0_8] : memref<1x8x128xbf16, #tpu.memory_space<vmem>>, vector<1x8x128xbf16>
    %11 = vector.shape_cast %10 : vector<1x8x128xbf16> to vector<8x128xbf16>
    %12 = vector.shape_cast %9 : vector<8x128xbf16> to vector<1x8x128xbf16>
    tpu.vector_store %arg5[%c0_6, %c0_7, %c0_8], %12 {strides = array<i32>} : memref<1x8x128xbf16, #tpu.memory_space<vmem>>, vector<1x8x128xbf16>,
    %13 = vector.extract_strided_slice %7 {offsets = [0, 128], sizes = [8, 128], strides = [1, 1]} : vector<8x384xf32> to vector<8x128xf32>
    %14 = arith.truncf %13 : vector<8x128xf32> to vector<8x128xbf16>
    %c0_9 = arith.constant 0 : index
    %c0_10 = arith.constant 0 : index
    %c0_11 = arith.constant 0 : index
    %15 = vector.load %arg6[%c0_9, %c0_10, %c0_11] : memref<1x8x128xbf16, #tpu.memory_space<vmem>>, vector<1x8x128xbf16>
    %16 = vector.shape_cast %15 : vector<1x8x128xbf16> to vector<8x128xbf16>
    %17 = vector.shape_cast %14 : vector<8x128xbf16> to vector<1x8x128xbf16>
    tpu.vector_store %arg6[%c0_9, %c0_10, %c0_11], %17 {strides = array<i32>} : memref<1x8x128xbf16, #tpu.memory_space<vmem>>, vector<1x8x128xbf16>,
    %18 = vector.extract_strided_slice %7 {offsets = [0, 256], sizes = [8, 128], strides = [1, 1]} : vector<8x384xf32> to vector<8x128xf32>
    %19 = arith.truncf %18 : vector<8x128xf32> to vector<8x128xbf16>
    %c0_12 = arith.constant 0 : index
    %c0_13 = arith.constant 0 : index
    %c0_14 = arith.constant 0 : index
    %20 = vector.load %arg7[%c0_12, %c0_13, %c0_14] : memref<1x8x128xbf16, #tpu.memory_space<vmem>>, vector<1x8x128xbf16>
    %21 = vector.shape_cast %20 : vector<1x8x128xbf16> to vector<8x128xbf16>
    %22 = vector.shape_cast %19 : vector<8x128xbf16> to vector<1x8x128xbf16>
    tpu.vector_store %arg7[%c0_12, %c0_13, %c0_14], %22 {strides = array<i32>} : memref<1x8x128xbf16, #tpu.memory_space<vmem>>, vector<1x8x128xbf16>,
    return
  }
  func.func @transform_0(%arg0: i32, %arg1: i32) -> (i32, i32, i32) {
    %c0_i32 = arith.constant 0 : i32
    %c0_i32_0 = arith.constant 0 : i32
    return %arg0, %arg1, %c0_i32 : i32, i32, i32
  }
  func.func @transform_1(%arg0: i32, %arg1: i32) -> (i32, i32) {
    %c0_i32 = arith.constant 0 : i32
    %c0_i32_0 = arith.constant 0 : i32
    %c0_i32_1 = arith.constant 0 : i32
    return %c0_i32, %c0_i32_0 : i32, i32
  }
  func.func @transform_2(%arg0: i32, %arg1: i32) -> (i32, i32) {
    %c0_i32 = arith.constant 0 : i32
    %c0_i32_0 = arith.constant 0 : i32
    %c0_i32_1 = arith.constant 0 : i32
    return %c0_i32, %c0_i32_0 : i32, i32
  }
  func.func @transform_3(%arg0: i32, %arg1: i32) -> (i32, i32, i32) {
    %c0_i32 = arith.constant 0 : i32
    %c0_i32_0 = arith.constant 0 : i32
    return %arg0, %arg1, %c0_i32 : i32, i32, i32
  }
  func.func @transform_4(%arg0: i32, %arg1: i32) -> (i32, i32, i32) {
    %c0_i32 = arith.constant 0 : i32
    %c0_i32_0 = arith.constant 0 : i32
    return %arg0, %arg1, %c0_i32 : i32, i32, i32
  }
  func.func @transform_5(%arg0: i32, %arg1: i32) -> (i32, i32, i32) {
    %c0_i32 = arith.constant 0 : i32
    %c0_i32_0 = arith.constant 0 : i32
    return %arg0, %arg1, %c0_i32 : i32, i32, i32
  }
}

module attributes {stable_mosaic.version = 11 : i64} {
  func.func @_qkv_proj_kernel(%arg0: i32, %arg1: i32, %arg2: memref<1x8x128xf32, #tpu.memory_space<vmem>>, %arg3: memref<128x384xbf16, #tpu.memory_space<vmem>>, %arg4: memref<1x384xf32, #tpu.memory_space<vmem>>, %arg5: memref<1x8x128xbf16, #tpu.memory_space<vmem>>, %arg6: memref<1x8x128xbf16, #tpu.memory_space<vmem>>, %arg7: memref<1x8x128xbf16, #tpu.memory_space<vmem>>) attributes {dimension_semantics = [#tpu.dimension_semantics<parallel>, #tpu.dimension_semantics<parallel>], iteration_bounds = array<i64: 2, 1>, scalar_prefetch = 0 : i64, scratch_operands = 0 : i64, tpu.core_type = #tpu.core_type<tc>, window_params = [{transform_indices = @transform_0, window_bounds = array<i64: 1, 8, 128>}, {pipeline_mode = #tpu.pipeline_mode<synchronous>, transform_indices = @transform_1, window_bounds = array<i64: 128, 384>}, {pipeline_mode = #tpu.pipeline_mode<synchronous>, transform_indices = @transform_2, window_bounds = array<i64: 1, 384>}, {transform_indices = @transform_3, window_bounds = array<i64: 1, 8, 128>}, {transform_indices = @transform_4, window_bounds = array<i64: 1, 8, 128>}, {transform_indices = @transform_5, window_bounds = array<i64: 1, 8, 128>}]} {
    %c0 = arith.constant 0 : index
    %c0_0 = arith.constant 0 : index
    %c0_1 = arith.constant 0 : index
    %0 = vector.load %arg2[%c0, %c0_0, %c0_1] : memref<1x8x128xf32, #tpu.memory_space<vmem>>, vector<1x8x128xf32>
    %1 = vector.shape_cast %0 : vector<1x8x128xf32> to vector<8x128xf32>
    %2 = arith.truncf %1 : vector<8x128xf32> to vector<8x128xbf16>
    %c0_2 = arith.constant 0 : index
    %c0_3 = arith.constant 0 : index
    %3 = vector.load %arg3[%c0_2, %c0_3] : memref<128x384xbf16, #tpu.memory_space<vmem>>, vector<128x384xbf16>
    %cst = arith.constant dense<0.000000e+00> : vector<8x384xf32>
    %4 = tpu.matmul %2, %3, %cst {dimension_numbers = #tpu.dot_dimension_numbers<[1], [0], [0], [1], [0, 0, 1, 1], [], []>} : vector<8x128xbf16>, vector<128x384xbf16>, vector<8x384xf32> -> vector<8x384xf32>
    %c0_4 = arith.constant 0 : index
    %c0_5 = arith.constant 0 : index
    %5 = vector.load %arg4[%c0_4, %c0_5] : memref<1x384xf32, #tpu.memory_space<vmem>>, vector<1x384xf32>
    %6 = vector.broadcast %5 : vector<1x384xf32> to vector<8x384xf32>
    %7 = arith.addf %4, %6 : vector<8x384xf32>
    %8 = vector.extract_strided_slice %7 {offsets = [0, 0], sizes = [8, 128], strides = [1, 1]} : vector<8x384xf32> to vector<8x128xf32>
    %9 = arith.truncf %8 : vector<8x128xf32> to vector<8x128xbf16>
    %c0_6 = arith.constant 0 : index
    %c0_7 = arith.constant 0 : index
    %c0_8 = arith.constant 0 : index
    %10 = vector.load %arg5[%c0_6, %c0_7, %c0_8] : memref<1x8x128xbf16, #tpu.memory_space<vmem>>, vector<1x8x128xbf16>
    %11 = vector.shape_cast %10 : vector<1x8x128xbf16> to vector<8x128xbf16>
    %12 = vector.shape_cast %9 : vector<8x128xbf16> to vector<1x8x128xbf16>
    tpu.vector_store %arg5[%c0_6, %c0_7, %c0_8], %12 {strides = array<i32>} : memref<1x8x128xbf16, #tpu.memory_space<vmem>>, vector<1x8x128xbf16>,
    %13 = vector.extract_strided_slice %7 {offsets = [0, 128], sizes = [8, 128], strides = [1, 1]} : vector<8x384xf32> to vector<8x128xf32>
    %14 = arith.truncf %13 : vector<8x128xf32> to vector<8x128xbf16>
    %c0_9 = arith.constant 0 : index
    %c0_10 = arith.constant 0 : index
    %c0_11 = arith.constant 0 : index
    %15 = vector.load %arg6[%c0_9, %c0_10, %c0_11] : memref<1x8x128xbf16, #tpu.memory_space<vmem>>, vector<1x8x128xbf16>
    %16 = vector.shape_cast %15 : vector<1x8x128xbf16> to vector<8x128xbf16>
    %17 = vector.shape_cast %14 : vector<8x128xbf16> to vector<1x8x128xbf16>
    tpu.vector_store %arg6[%c0_9, %c0_10, %c0_11], %17 {strides = array<i32>} : memref<1x8x128xbf16, #tpu.memory_space<vmem>>, vector<1x8x128xbf16>,
    %18 = vector.extract_strided_slice %7 {offsets = [0, 256], sizes = [8, 128], strides = [1, 1]} : vector<8x384xf32> to vector<8x128xf32>
    %19 = arith.truncf %18 : vector<8x128xf32> to vector<8x128xbf16>
    %c0_12 = arith.constant 0 : index
    %c0_13 = arith.constant 0 : index
    %c0_14 = arith.constant 0 : index
    %20 = vector.load %arg7[%c0_12, %c0_13, %c0_14] : memref<1x8x128xbf16, #tpu.memory_space<vmem>>, vector<1x8x128xbf16>
    %21 = vector.shape_cast %20 : vector<1x8x128xbf16> to vector<8x128xbf16>
    %22 = vector.shape_cast %19 : vector<8x128xbf16> to vector<1x8x128xbf16>
    tpu.vector_store %arg7[%c0_12, %c0_13, %c0_14], %22 {strides = array<i32>} : memref<1x8x128xbf16, #tpu.memory_space<vmem>>, vector<1x8x128xbf16>,
    return
  }
  func.func @transform_0(%arg0: i32, %arg1: i32) -> (i32, i32, i32) {
    %c0_i32 = arith.constant 0 : i32
    %c0_i32_0 = arith.constant 0 : i32
    return %arg0, %arg1, %c0_i32 : i32, i32, i32
  }
  func.func @transform_1(%arg0: i32, %arg1: i32) -> (i32, i32) {
    %c0_i32 = arith.constant 0 : i32
    %c0_i32_0 = arith.constant 0 : i32
    %c0_i32_1 = arith.constant 0 : i32
    return %c0_i32, %c0_i32_0 : i32, i32
  }
  func.func @transform_2(%arg0: i32, %arg1: i32) -> (i32, i32) {
    %c0_i32 = arith.constant 0 : i32
    %c0_i32_0 = arith.constant 0 : i32
    %c0_i32_1 = arith.constant 0 : i32
    return %c0_i32, %c0_i32_0 : i32, i32
  }
  func.func @transform_3(%arg0: i32, %arg1: i32) -> (i32, i32, i32) {
    %c0_i32 = arith.constant 0 : i32
    %c0_i32_0 = arith.constant 0 : i32
    return %arg0, %arg1, %c0_i32 : i32, i32, i32
  }
  func.func @transform_4(%arg0: i32, %arg1: i32) -> (i32, i32, i32) {
    %c0_i32 = arith.constant 0 : i32
    %c0_i32_0 = arith.constant 0 : i32
    return %arg0, %arg1, %c0_i32 : i32, i32, i32
  }
  func.func @transform_5(%arg0: i32, %arg1: i32) -> (i32, i32, i32) {
    %c0_i32 = arith.constant 0 : i32
    %c0_i32_0 = arith.constant 0 : i32
    return %arg0, %arg1, %c0_i32 : i32, i32, i32
  }
}

</mosaic_0001>

<bundles_post_ra>
// kernel: tpu_custom_call.1
= control target key start
LH: loop header
LB: loop body
LE: loop exit
PB: predicated region body
PF: predicated region fallthrough
CT: control target
= control target key end

     0   :  { %s1472_s0 = inlined_call_operand.hbm [shape: f32[2,8,128], index: 0, kind: input, shape index: {}]   ;;  %s1473_s1 = inlined_call_operand.hbm [shape: bf16[128,384], index: 1, kind: input, shape index: {}]   ;;  %s1474_s2 = inlined_call_operand.hbm [shape: f32[1,384], index: 2, kind: input, shape index: {}]   ;;  %s1475_s3 = inlined_call_operand.hbm [shape: bf16[2,8,128], index: 3, kind: output, shape index: {0}]   ;;  %s1476_s4 = inlined_call_operand.hbm [shape: bf16[2,8,128], index: 4, kind: output, shape index: {1}]   ;;  %s1477_s5 = inlined_call_operand.hbm [shape: bf16[2,8,128], index: 5, kind: output, shape index: {2}]  }
   0x1   :  { %1483 = sst [smem:[#allocation18_spill]] %s1472_s0 }
   0x2   :  { %1484 = sst [smem:[#allocation19_spill]] %s1473_s1 }
   0x3   :  { %11 = vsyncpa [#allocation3], 0 }
   0x4   :  { %13 = vsyncpa [#allocation3 + $0x1], 0 }
   0x5   :  { %14 = vsyncpa [#allocation6], 0 }
   0x6   :  { %15 = vsyncpa [#allocation4], 0 }
   0x7   :  { %17 = vsyncpa [#allocation4 + $0x1], 0 }
   0x8   :  { %18 = vsyncpa [#allocation10], 0 }
   0x9   :  { %20 = vsyncpa [#allocation10 + $0x1], 0  ;;  %s1258_s18 = smov 0   ;;  %s1260_s19 = smov 0  }
   0xa   :  { %s1262_s20 = smov 0   ;;  %s1264_s21 = smov 0  }
   0xb   :  { %s1266_s22 = smov 0   ;;  %s1268_s23 = smov 0  }
   0xc LB: > { %s1289_s24 = sadd.s32 4294967295, %s1222_s23   ;;  %p750_p0 = scmp.ge.s32.totalorder %s1222_s23, 1  ;;  %s1222_s23 = sphi %s1268_s23, %s26_s23   ;;  %s1218_s22 = sphi %s1266_s22, %s1505_s22   ;;  %s1214_s21 = sphi %s1264_s21, %s1504_s21   ;;  %s1210_s20 = sphi %s1262_s20, %s1503_s20   ;;  %s1206_s19 = sphi %s1260_s19, %s1502_s19   ;;  %s1202_s18 = sphi %s1258_s18, %s1501_s18  }
   0xd   : > { %p61_p1 = scmp.eq.s32.totalorder %s1289_s24, 0  ;;  %p197_p2 = scmp.lt.s32.totalorder %s1222_s23, 3 }
   0xe   : > { %s1485_s1 = sld [smem:[#allocation19_spill]]  ;;  %s1224_s29 = smov [#allocation5]  }
   0xf   : > { %p1297_p3 = pnand %p750_p0, %p197_p2  ;;  %s210_s30 = sshll.u32 %s1224_s29, 4  ;;  %s211_s30 = int_to_ptr.vmem [resolvable:$true] %s210_s30 }
  0x10   : > { %p753_p6 = scmp.ge.s32.totalorder %s1222_s23, 2  ;;  %s223_s8 = sshll.u32 %s1474_s2, 4  ;;  %s224_s8 = int_to_ptr.hbm [resolvable:$true] %s223_s8 }
  0x11   : > { %p907_p4 = pneg %p1297_p3  ;;  %s1225_s9 = smov 192  }
  0x12   : > { %s1226_s10 = smov 12   ;;  %s1227_s11 = smov [#allocation7]  }
  0x13   : > { %p908_p5 = pnand %p907_p4, %p61_p1  ;;  %s225_s12 = sshll.u32 %s1227_s11, 4  ;;  %s226_s12 = int_to_ptr.vmem [resolvable:$true] %s225_s12 }
  0x14   : > { %s208_s27 = sshll.u32 %s1485_s1, 4  ;;  %s38_s13 = sadd.s32 1, %s1218_s22  ;;  %s209_s27 = int_to_ptr.hbm [resolvable:$true] %s208_s27 }
  0x15   : > { %910 = dma.hbm_to_vmem [thread:$0]  (!%p908_p5), %s209_s27, 3072, %s211_s30, [#allocation6], %s1225_s9, %s1225_s9, %s1226_s10  }
  0x16   : > { %913 = dma.hbm_to_vmem [thread:$0]  (!%p908_p5), %s224_s8, 48, %s226_s12, [#allocation6]  }
  0x17   : > { %s1478_s14 = sadd.s32 4294967294, %s1222_s23   ;;  %p40_p7 = scmp.ge.s32.totalorder %s38_s13, 2 }
  0x18   : > { %s47_s15 = sadd.s32 1, %s1210_s20  ;;  %p54_p8 = scmp.ne.s32.totalorder %s1210_s20, %s1206_s19 }
  0x19   : > { %s1507_s13 = smov (%p40_p7, %s38_s13), 0  ;;  %p55_p9 = scmp.eq.s32.totalorder %s1222_s23, 0 }
  0x1a   : > { %p60_p10 = scmp.ne.s32.totalorder %s1206_s19, %s1202_s18  ;;  %s42_s16 = ssub.s32 %s1218_s22, %s1507_s13 }
  0x1b   : > { %p128_p11 = scmp.eq.s32.totalorder %s1289_s24, 1  ;;  %p45_p12 = scmp.eq.s32.totalorder %s42_s16, 0 }
  0x1c   : > { %p1324_p13 = por %p61_p1, %p60_p10  ;;  %p134_p2 = scmp.eq.s32.totalorder %s1478_s14, 1 }
  0x1d   : > { %p1328_p0 = por %p128_p11, %p54_p8  ;;  %p56_p4 = por %p55_p9, %p54_p8 }
  0x1e   : > { %s1335_s26 = scalar_select %p45_p12, %s1210_s20, %s47_s15  }
  0x1f   : > { %p1337_p5 = por %p134_p2, %p60_p10  ;;  %s236_s29 = sand.u32 1, %s1210_s20  }
  0x20   : > { %s755_s30 = sshll.u32 %s1218_s22, 3  ;;  %p930_p7 = scmp.lt.s32.totalorder %s1222_s23, 2 }
  0x21   : > { %s754_s6 = sshll.u32 %s236_s29, 3  ;;  %s1490_s0 = sld [smem:[#allocation18_spill]] }
  0x22   : > { %s240_s11 = scalar_lea.vmem [#allocation2], %s754_s6  ;;  %p915_p11 = pnand %p930_p7, %p56_p4 }
  0x23   : > { %s249_s12 = sshll.u32 %s240_s11, 4  ;;  %s237_s15 = scalar_lea.sflag [#allocation3], %s236_s29  ;;  %s250_s12 = int_to_ptr.vmem [resolvable:$true] %s249_s12 }
  0x25   : > { %258 = sbr.rel (%p1297_p3) target bundleno = 247 (0xf7), region = 32 }
  0x27   : > { %s245_s9 = scalar_lea.hbm %s1490_s0, %s755_s30 }
  0x28   : > { %s247_s10 = sshll.u32 %s245_s9, 4  ;;  %s248_s10 = int_to_ptr.hbm [resolvable:$true] %s247_s10 }
  0x29   : > { %917 = dma.hbm_to_vmem [thread:$0]  (!%p915_p11), %s248_s10, 128, %s250_s12, %s237_s15  }
  0x2a   : > { %s1350_s16 = sand.u32 1, %s1206_s19  }
  0x2b   : > { %s757_s14 = sshll.u32 %s1350_s16, 3  ;;  %s261_s7 = scalar_lea.sflag [#allocation3], %s1350_s16 }
  0x2c   : > { %s1354_s30 = scalar_lea.vmem [#allocation2], %s757_s14 }
  0x2d   : > { %1185 = dma.done.wait (%p1324_p13), %s261_s7, 128  }
  0x2e   : > { %1187 = vsyncadd (%p1324_p13), %s261_s7, 4294967168 }
  0x2f   : > { %1189 = dma.done.wait (%p61_p1), [#allocation6], 3120  }
  0x30   : > { %1191 = vsyncadd (%p61_p1), [#allocation6], 4294964176  ;;  %v849_v0 = vld [vmem:[#allocation5 + $0xa8] sm:$0xf]  ;;  %v889_v1 = vld [vmem:[#allocation5 + $0xb0] sm:$0xf0] }
  0x31   : > { %v888_v2 = vld [vmem:[#allocation5 + $0xac] sm:$0xf]  ;;  %v850_v3 = vor.u32 %v889_v1, %v849_v0  ;;  %v851_v4 = vld [vmem:[#allocation5 + $0xb4] sm:$0xf0]  ;;  %v857_v5 = vld [vmem:[#allocation5 + $0xb0] sm:$0xf] }
  0x32   : > { %v890_v6 = vld [vmem:[#allocation5 + $0xb8] sm:$0xf0]  ;;  %v854_v7 = vor.u32 %v888_v2, %v851_v4  ;;  %v837_v9 = vld [vmem:[#allocation5 + $0x90] sm:$0xf]  ;;  %v885_v11 = vld [vmem:[#allocation5 + $0x94] sm:$0xf] }
  0x33   : > { %v858_v8 = vor.u32 %v890_v6, %v857_v5  ;;  %v886_v10 = vld [vmem:[#allocation5 + $0x98] sm:$0xf0]  ;;  %482 = vmatpush.bf16.msra.mxu0 %v850_v3  ;;  %v839_v13 = vld [vmem:[#allocation5 + $0x9c] sm:$0xf0]  ;;  %v845_v14 = vld [vmem:[#allocation5 + $0x98] sm:$0xf] }
  0x34   : > { %v838_v12 = vor.u32 %v886_v10, %v837_v9  ;;  %v887_v15 = vld [vmem:[#allocation5 + $0xa0] sm:$0xf0]  ;;  %495 = vmatpush.bf16.msra.mxu1 %v854_v7  ;;  %v842_v16 = vor.u32 %v885_v11, %v839_v13  ;;  %v825_v18 = vld [vmem:[#allocation5 + $0x78] sm:$0xf]  ;;  %v882_v20 = vld [vmem:[#allocation5 + $0x7c] sm:$0xf] }
  0x35   : > { %508 = vmatpush.bf16.msra.mxu2 %v858_v8  ;;  %v846_v17 = vor.u32 %v887_v15, %v845_v14  ;;  %v883_v19 = vld [vmem:[#allocation5 + $0x80] sm:$0xf0]  ;;  %v827_v21 = vld [vmem:[#allocation5 + $0x84] sm:$0xf0]  ;;  %v833_v22 = vld [vmem:[#allocation5 + $0x80] sm:$0xf] }
  0x36   : > { %v884_v23 = vld [vmem:[#allocation5 + $0x88] sm:$0xf0]  ;;  %v826_v24 = vor.u32 %v883_v19, %v825_v18  ;;  %v830_v25 = vor.u32 %v882_v20, %v827_v21  ;;  %v813_v27 = vld [vmem:[#allocation5 + $0x60] sm:$0xf]  ;;  %v879_v29 = vld [vmem:[#allocation5 + $0x64] sm:$0xf] }
  0x37   : > { %483 = vmatpush.bf16.msra.mxu0 %v838_v12  ;;  %v834_v26 = vor.u32 %v884_v23, %v833_v22  ;;  %v880_v28 = vld [vmem:[#allocation5 + $0x68] sm:$0xf0]  ;;  %v815_v30 = vld [vmem:[#allocation5 + $0x6c] sm:$0xf0]  ;;  %v821_v31 = vld [vmem:[#allocation5 + $0x68] sm:$0xf] }
  0x38   : > { %496 = vmatpush.bf16.msra.mxu1 %v842_v16  ;;  %v881_v32 = vld [vmem:[#allocation5 + $0x70] sm:$0xf0]  ;;  %v814_v33 = vor.u32 %v880_v28, %v813_v27  ;;  %v818_v34 = vor.u32 %v879_v29, %v815_v30  ;;  %v801_v36 = vld [vmem:[#allocation5 + $0x48] sm:$0xf]  ;;  %v876_v38 = vld [vmem:[#allocation5 + $0x4c] sm:$0xf] }
  0x39   : > { %509 = vmatpush.bf16.msra.mxu2 %v846_v17  ;;  %v822_v35 = vor.u32 %v881_v32, %v821_v31  ;;  %v877_v37 = vld [vmem:[#allocation5 + $0x50] sm:$0xf0]  ;;  %v803_v39 = vld [vmem:[#allocation5 + $0x54] sm:$0xf0]  ;;  %v809_v40 = vld [vmem:[#allocation5 + $0x50] sm:$0xf] }
  0x3a   : > { %v878_v41 = vld [vmem:[#allocation5 + $0x58] sm:$0xf0]  ;;  %v802_v42 = vor.u32 %v877_v37, %v801_v36  ;;  %v806_v43 = vor.u32 %v876_v38, %v803_v39  ;;  %v789_v45 = vld [vmem:[#allocation5 + $0x30] sm:$0xf]  ;;  %v873_v47 = vld [vmem:[#allocation5 + $0x34] sm:$0xf] }
  0x3b   : > { %484 = vmatpush.bf16.msra.mxu0 %v826_v24  ;;  %v810_v44 = vor.u32 %v878_v41, %v809_v40  ;;  %v874_v46 = vld [vmem:[#allocation5 + $0x38] sm:$0xf0]  ;;  %v791_v48 = vld [vmem:[#allocation5 + $0x3c] sm:$0xf0]  ;;  %v797_v49 = vld [vmem:[#allocation5 + $0x38] sm:$0xf] }
  0x3c   : > { %497 = vmatpush.bf16.msra.mxu1 %v830_v25  ;;  %v875_v50 = vld [vmem:[#allocation5 + $0x40] sm:$0xf0]  ;;  %v790_v51 = vor.u32 %v874_v46, %v789_v45  ;;  %v794_v52 = vor.u32 %v873_v47, %v791_v48  ;;  %v777_v54 = vld [vmem:[#allocation5 + $0x18] sm:$0xf]  ;;  %v870_v56 = vld [vmem:[#allocation5 + $0x1c] sm:$0xf] }
  0x3d   : > { %510 = vmatpush.bf16.msra.mxu2 %v834_v26  ;;  %v798_v53 = vor.u32 %v875_v50, %v797_v49  ;;  %v871_v55 = vld [vmem:[#allocation5 + $0x20] sm:$0xf0]  ;;  %v779_v57 = vld [vmem:[#allocation5 + $0x24] sm:$0xf0]  ;;  %v785_v58 = vld [vmem:[#allocation5 + $0x20] sm:$0xf] }
  0x3e   : > { %v872_v59 = vld [vmem:[#allocation5 + $0x28] sm:$0xf0]  ;;  %v778_v60 = vor.u32 %v871_v55, %v777_v54  ;;  %v782_v61 = vor.u32 %v870_v56, %v779_v57  ;;  %v765_v63 = vld [vmem:[#allocation5] sm:$0xf]  ;;  %v867_v1 = vld [vmem:[#allocation5 + $0x4] sm:$0xf] }
  0x3f   : > { %485 = vmatpush.bf16.msra.mxu0 %v814_v33  ;;  %v786_v62 = vor.u32 %v872_v59, %v785_v58  ;;  %v868_v0 = vld [vmem:[#allocation5 + $0x8] sm:$0xf0]  ;;  %v767_v2 = vld [vmem:[#allocation5 + $0xc] sm:$0xf0]  ;;  %v773_v3 = vld [vmem:[#allocation5 + $0x8] sm:$0xf] }
  0x40   : > { %498 = vmatpush.bf16.msra.mxu1 %v818_v34  ;;  %v869_v4 = vld [vmem:[#allocation5 + $0x10] sm:$0xf0]  ;;  %v766_v5 = vor.u32 %v868_v0, %v765_v63  ;;  %v770_v7 = vor.u32 %v867_v1, %v767_v2  ;;  %s1366_s28 = sshll.u32 %s1350_s16, 2  ;;  %v346_v10 = vld [vmem:[#allocation7] sm:$0x7]  ;;  %s862_s14 = sshll.u32 %s1214_s21, 2 }
  0x41   : > { %511 = vmatpush.bf16.msra.mxu2 %v822_v35  ;;  %v312_v6 = vld [vmem:[%s1354_s30] sm:$0xff]  ;;  %v774_v8 = vor.u32 %v869_v4, %v773_v3  ;;  %v348_v11 = vperm.slane %v346_v10, 0  ;;  %s549_s6 = scalar_lea.hbm %s1475_s3, %s862_s14  ;;  %v349_v12 = vperm.slane %v346_v10, 1  ;;  %s564_s11 = scalar_lea.hbm %s1476_s4, %s862_s14  ;;  %v350_v19 = vperm.slane %v346_v10, 2 }
  0x42   : > { %v313_v9 = vpack.c.bf16 %v312_v6, %v312_v6  ;;  %s304_s12 = scalar_lea.vmem [#allocation9], %s1366_s28  ;;  %s297_s7 = scalar_lea.vmem [#allocation8], %s1366_s28 }
  0x43   : > { %486 = vmatpush.bf16.msra.mxu0 %v802_v42  ;;  %s1377_s15 = sshll.u32 %s304_s12, 4  ;;  %s1380_s30 = sshll.u32 %s297_s7, 4  ;;  %s552_s30 = int_to_ptr.vmem [resolvable:$true] %s1380_s30 }
  0x44   : > { %499 = vmatpush.bf16.msra.mxu1 %v806_v43  ;;  %1491 = sst [smem:[#allocation16_spill]] %s1377_s15  ;;  %s1382_s21 = sshll.u32 %s549_s6, 4  ;;  %s554_s21 = int_to_ptr.hbm [resolvable:$true] %s1382_s21 }
  0x45   : > { %512 = vmatpush.bf16.msra.mxu2 %v810_v44  ;;  %s1384_s17 = sshll.u32 %s564_s11, 4  ;;  %s579_s10 = scalar_lea.hbm %s1477_s5, %s862_s14 }
  0x46   : > { %1492 = sst [smem:[#allocation17_spill]] %s1384_s17  ;;  %s1482_s6 = scalar_lea.vmem [#allocation11], %s1366_s28 }
  0x47   : > { %487 = vmatpush.bf16.msra.mxu0 %v790_v51  ;;  %s1396_s8 = sshll.u32 %s1482_s6, 4  ;;  %s1398_s11 = sshll.u32 %s579_s10, 4  ;;  %s582_s8 = int_to_ptr.vmem [resolvable:$true] %s1396_s8  ;;  %s584_s11 = int_to_ptr.hbm [resolvable:$true] %s1398_s11 }
  0x48   : > { %500 = vmatpush.bf16.msra.mxu1 %v794_v52  ;;  %s528_s0 = scalar_lea.sflag [#allocation4], %s1350_s16  ;;  %s1090_s1 = sshra.s32 %s554_s21, 4  ;;  %s1091_s1 = int_to_ptr.hbm [resolvable:$true] %s1090_s1 }
  0x49   : > { %513 = vmatpush.bf16.msra.mxu2 %v798_v53  ;;  %s1092_s14 = scalar_lea.hbm %s1091_s1, 4  ;;  %s1096_s15 = scalar_lea.hbm %s1475_s3, 8 }
  0x4a   : > { %p1093_p1 = scmp.ne.s32.totalorder %s1091_s1, %s1092_s14  ;;  %p1097_p9 = scmp.lt.s32.totalorder %s1091_s1, %s1475_s3 }
  0x4b   : > { %488 = vmatpush.bf16.msra.mxu0 %v778_v60  ;;  %p1098_p10 = scmp.lt.s32.totalorder %s1096_s15, %s1092_s14 }
  0x4c   : > { %501 = vmatpush.bf16.msra.mxu1 %v782_v61  ;;  %p1094_p3 = pnand %p1093_p1, %p1328_p0 }
  0x4d   : > { %514 = vmatpush.bf16.msra.mxu2 %v786_v62  ;;  %p1099_p12 = por %p1098_p10, %p1097_p9 }
  0x4e   : > { %p1095_p8 = pneg %p1094_p3 }
  0x4f   : > { %489 = vmatpush.bf16.msra.mxu0 %v766_v5 }
  0x50   : > { %502 = vmatpush.bf16.msra.mxu1 %v770_v7  ;;  %p1100_p13 = pnand %p1099_p12, %p1095_p8 }
  0x51   : > { %515 = vmatpush.bf16.msra.mxu2 %v774_v8 }
  0x52   : > { %490 = vmatmul.bf16.vlgmr.msra.gmra.mxu0 %v313_v9 }
  0x53   : > { %503 = vmatmul.bf16.vlgmr.msra.gmra.mxu1 %v313_v9 }
  0x54   : > { %516 = vmatmul.bf16.vlgmr.msra.gmra.mxu2 %v313_v9 }
  0xcf   : > { %v491_v13 = vpop.f32.mrf.mxu0 }
  0xd0   : > { %v492_v14 = vadd.f32 %v491_v13, %v348_v11  ;;  %v504_v15 = vpop.f32.mrf.mxu1 }
  0xd1   : > { %v505_v16 = vadd.f32 %v504_v15, %v349_v12 }
  0xd2   : > { %v521_v17 = vpack.c.bf16 %v492_v14, %v492_v14 }
  0xd3   : > { %v523_v18 = vpack.c.bf16 %v505_v16, %v505_v16 }
  0xd4   : > { %522 = vst [vmem:[%s297_s7] sm:$0xf] %v521_v17 }
  0xd5   : > { %524 = vst [vmem:[%s304_s12] sm:$0xf] %v523_v18 }
  0xd6   : > { %1103 = shalt.err (!%p1100_p13)
}
  0xd7   : > { %s1493_s16 = sld [smem:[#allocation17_spill]]  ;;  %v517_v20 = vpop.f32.mrf.mxu2  ;;  %s1494_s12 = sand.u32 1, %s1289_s24  }
  0xd8   : > { %901 = dma.vmem_to_hbm [thread:$0]  (%p1328_p0), %s552_s30, 64, %s554_s21, %s528_s0  }
  0xd9   : > { %s1413_s10 = scalar_lea.sflag [#allocation10], %s1494_s12  ;;  %s1124_s17 = scalar_lea.hbm %s1476_s4, 8 }
  0xdd   : > { %s1495_s29 = int_to_ptr.hbm [resolvable:$true] %s1493_s16 }
  0xde   : > { %s1118_s9 = sshra.s32 %s1495_s29, 4  ;;  %s1119_s9 = int_to_ptr.hbm [resolvable:$true] %s1118_s9 }
  0xdf   : > { %s1120_s6 = scalar_lea.hbm %s1119_s9, 4  ;;  %p1125_p11 = scmp.lt.s32.totalorder %s1119_s9, %s1476_s4 }
  0xe0   : > { %p1121_p2 = scmp.ne.s32.totalorder %s1119_s9, %s1120_s6  ;;  %p1126_p1 = scmp.lt.s32.totalorder %s1124_s17, %s1120_s6 }
  0xe2   : > { %p1122_p4 = pnand %p1121_p2, %p1328_p0  ;;  %p1127_p3 = por %p1126_p1, %p1125_p11 }
  0xe4   : > { %p1123_p7 = pneg %p1122_p4 }
  0xe6   : > { %p1128_p8 = pnand %p1127_p3, %p1123_p7 }
  0xe8   : > { %1131 = shalt.err (!%p1128_p8)
}
  0xe9   : > { %s1496_s0 = smov %s1495_s29  ;;  %s1497_s24 = sld [smem:[#allocation16_spill]]  ;;  %v518_v21 = vadd.f32 %v517_v20, %v350_v19  ;;  %v493_v22 = vpop.f32.mrf.mxu0  ;;  %v506_v23 = vpop.f32.mrf.mxu1 }
  0xea   : > { %s1499_s21 = scalar_lea.vmem [#allocation11], %s1366_s28  ;;  %s1146_s6 = sshra.s32 %s584_s11, 4  ;;  %s1147_s6 = int_to_ptr.hbm [resolvable:$true] %s1146_s6 }
  0xeb   : > { %v525_v24 = vpack.c.bf16 %v518_v21, %v518_v21  ;;  %s1148_s12 = scalar_lea.hbm %s1147_s6, 4  ;;  %s1152_s9 = scalar_lea.hbm %s1477_s5, 8 }
  0xec   : > { %p1149_p9 = scmp.ne.s32.totalorder %s1147_s6, %s1148_s12  ;;  %p1153_p13 = scmp.lt.s32.totalorder %s1147_s6, %s1477_s5 }
  0xed   : > { %526 = vst [vmem:[%s1499_s21] sm:$0xf] %v525_v24  ;;  %p1154_p2 = scmp.lt.s32.totalorder %s1152_s9, %s1148_s12 }
  0xee   : > { %p1150_p10 = pnand %p1149_p9, %p1328_p0 }
  0xef   : > { %s1498_s30 = int_to_ptr.vmem [resolvable:$true] %s1497_s24  ;;  %p1155_p4 = por %p1154_p2, %p1153_p13 }
  0xf0   : > { %902 = dma.vmem_to_hbm [thread:$0]  (%p1328_p0), %s1498_s30, 64, %s1496_s0, %s1413_s10  }
  0xf1   : > { %p1151_p12 = pneg %p1150_p10 }
  0xf3   : > { %p1156_p7 = pnand %p1155_p4, %p1151_p12 }
  0xf5   : > { %1159 = shalt.err (!%p1156_p7)
}
  0xf6   : > { %903 = dma.vmem_to_hbm [thread:$0]  (%p1328_p0), %s582_s8, 64, %s584_s11, %s1413_s10   ;;  %v519_v25 = vpop.f32.mrf.mxu2 }
  0xf7 PF: > { %s595_s28 = sand.u32 1, %s1202_s18   ;;  %p919_p11 = pnand %p753_p6, %p1337_p5 }
  0xf8   : > { %s596_s17 = scalar_lea.sflag [#allocation4], %s595_s28 }
  0xf9   : > { %p920_p1 = pneg %p919_p11 }
  0xfb   : > { %1193 = dma.done.wait (%p920_p1), %s596_s17, 64  }
  0xfc   : > { %1195 = vsyncadd (%p920_p1), %s596_s17, 4294967232  ;;  %s1500_s14 = sadd.s32 4294967294, %s1222_s23  }
  0xfd   : > { %s605_s7 = sand.u32 1, %s1500_s14  }
  0xfe   : > { %s606_s0 = scalar_lea.sflag [#allocation10], %s605_s7 }
  0xff   : > { %1197 = dma.done.wait (%p920_p1), %s606_s0, 128  }
 0x100   : > { %1199 = vsyncadd (%p920_p1), %s606_s0, 4294967168  ;;  %s26_s23 = sadd.s32 1, %s1222_s23   ;;  %s1501_s18 = smov %s1206_s19 }
 0x101   : > { %p23_p0 = scmp.ge.s32.totalorder %s26_s23, 4   ;;  %s1502_s19 = smov %s1210_s20 }
 0x102   : > { %s1503_s20 = smov %s1335_s26  ;;  %s1504_s21 = smov %s1218_s22 }
 0x103   : > { %s1505_s22 = smov %s1507_s13  ;;  %25 = sbr.rel (!%p23_p0) target bundleno = 12 (0xc), region = 117 }
 0x108   :  { %622 = vsyncpa [#allocation3], 1 }
 0x109   :  { %624 = vsyncpa [#allocation3 + $0x1], 1 }
 0x10a   :  { %625 = vsyncpa [#allocation6], 1 }
 0x10b   :  { %626 = vsyncpa [#allocation4], 1 }
 0x10c   :  { %628 = vsyncpa [#allocation4 + $0x1], 1 }
 0x10d   :  { %629 = vsyncpa [#allocation10], 1 }
 0x10e   :  { %631 = vsyncpa [#allocation10 + $0x1], 1 }

// kernel: tpu_custom_call.1
= control target key start
LH: loop header
LB: loop body
LE: loop exit
PB: predicated region body
PF: predicated region fallthrough
CT: control target
= control target key end

     0   :  { %s1472_s0 = inlined_call_operand.hbm [shape: f32[2,8,128], index: 0, kind: input, shape index: {}]   ;;  %s1473_s1 = inlined_call_operand.hbm [shape: bf16[128,384], index: 1, kind: input, shape index: {}]   ;;  %s1474_s2 = inlined_call_operand.hbm [shape: f32[1,384], index: 2, kind: input, shape index: {}]   ;;  %s1475_s3 = inlined_call_operand.hbm [shape: bf16[2,8,128], index: 3, kind: output, shape index: {0}]   ;;  %s1476_s4 = inlined_call_operand.hbm [shape: bf16[2,8,128], index: 4, kind: output, shape index: {1}]   ;;  %s1477_s5 = inlined_call_operand.hbm [shape: bf16[2,8,128], index: 5, kind: output, shape index: {2}]  }
   0x1   :  { %1483 = sst [smem:[#allocation18_spill]] %s1472_s0 }
   0x2   :  { %1484 = sst [smem:[#allocation19_spill]] %s1473_s1 }
   0x3   :  { %11 = vsyncpa [#allocation3], 0 }
   0x4   :  { %13 = vsyncpa [#allocation3 + $0x1], 0 }
   0x5   :  { %14 = vsyncpa [#allocation6], 0 }
   0x6   :  { %15 = vsyncpa [#allocation4], 0 }
   0x7   :  { %17 = vsyncpa [#allocation4 + $0x1], 0 }
   0x8   :  { %18 = vsyncpa [#allocation10], 0 }
   0x9   :  { %20 = vsyncpa [#allocation10 + $0x1], 0  ;;  %s1258_s18 = smov 0   ;;  %s1260_s19 = smov 0  }
   0xa   :  { %s1262_s20 = smov 0   ;;  %s1264_s21 = smov 0  }
   0xb   :  { %s1266_s22 = smov 0   ;;  %s1268_s23 = smov 0  }
   0xc LB: > { %s1289_s24 = sadd.s32 4294967295, %s1222_s23   ;;  %p750_p0 = scmp.ge.s32.totalorder %s1222_s23, 1  ;;  %s1222_s23 = sphi %s1268_s23, %s26_s23   ;;  %s1218_s22 = sphi %s1266_s22, %s1505_s22   ;;  %s1214_s21 = sphi %s1264_s21, %s1504_s21   ;;  %s1210_s20 = sphi %s1262_s20, %s1503_s20   ;;  %s1206_s19 = sphi %s1260_s19, %s1502_s19   ;;  %s1202_s18 = sphi %s1258_s18, %s1501_s18  }
   0xd   : > { %p61_p1 = scmp.eq.s32.totalorder %s1289_s24, 0  ;;  %p197_p2 = scmp.lt.s32.totalorder %s1222_s23, 3 }
   0xe   : > { %s1485_s1 = sld [smem:[#allocation19_spill]]  ;;  %s1224_s29 = smov [#allocation5]  }
   0xf   : > { %p1297_p3 = pnand %p750_p0, %p197_p2  ;;  %s210_s30 = sshll.u32 %s1224_s29, 4  ;;  %s211_s30 = int_to_ptr.vmem [resolvable:$true] %s210_s30 }
  0x10   : > { %p753_p6 = scmp.ge.s32.totalorder %s1222_s23, 2  ;;  %s223_s8 = sshll.u32 %s1474_s2, 4  ;;  %s224_s8 = int_to_ptr.hbm [resolvable:$true] %s223_s8 }
  0x11   : > { %p907_p4 = pneg %p1297_p3  ;;  %s1225_s9 = smov 192  }
  0x12   : > { %s1226_s10 = smov 12   ;;  %s1227_s11 = smov [#allocation7]  }
  0x13   : > { %p908_p5 = pnand %p907_p4, %p61_p1  ;;  %s225_s12 = sshll.u32 %s1227_s11, 4  ;;  %s226_s12 = int_to_ptr.vmem [resolvable:$true] %s225_s12 }
  0x14   : > { %s208_s27 = sshll.u32 %s1485_s1, 4  ;;  %s38_s13 = sadd.s32 1, %s1218_s22  ;;  %s209_s27 = int_to_ptr.hbm [resolvable:$true] %s208_s27 }
  0x15   : > { %910 = dma.hbm_to_vmem [thread:$0]  (!%p908_p5), %s209_s27, 3072, %s211_s30, [#allocation6], %s1225_s9, %s1225_s9, %s1226_s10  }
  0x16   : > { %913 = dma.hbm_to_vmem [thread:$0]  (!%p908_p5), %s224_s8, 48, %s226_s12, [#allocation6]  }
  0x17   : > { %s1478_s14 = sadd.s32 4294967294, %s1222_s23   ;;  %p40_p7 = scmp.ge.s32.totalorder %s38_s13, 2 }
  0x18   : > { %s47_s15 = sadd.s32 1, %s1210_s20  ;;  %p54_p8 = scmp.ne.s32.totalorder %s1210_s20, %s1206_s19 }
  0x19   : > { %s1507_s13 = smov (%p40_p7, %s38_s13), 0  ;;  %p55_p9 = scmp.eq.s32.totalorder %s1222_s23, 0 }
  0x1a   : > { %p60_p10 = scmp.ne.s32.totalorder %s1206_s19, %s1202_s18  ;;  %s42_s16 = ssub.s32 %s1218_s22, %s1507_s13 }
  0x1b   : > { %p128_p11 = scmp.eq.s32.totalorder %s1289_s24, 1  ;;  %p45_p12 = scmp.eq.s32.totalorder %s42_s16, 0 }
  0x1c   : > { %p1324_p13 = por %p61_p1, %p60_p10  ;;  %p134_p2 = scmp.eq.s32.totalorder %s1478_s14, 1 }
  0x1d   : > { %p1328_p0 = por %p128_p11, %p54_p8  ;;  %p56_p4 = por %p55_p9, %p54_p8 }
  0x1e   : > { %s1335_s26 = scalar_select %p45_p12, %s1210_s20, %s47_s15  }
  0x1f   : > { %p1337_p5 = por %p134_p2, %p60_p10  ;;  %s236_s29 = sand.u32 1, %s1210_s20  }
  0x20   : > { %s755_s30 = sshll.u32 %s1218_s22, 3  ;;  %p930_p7 = scmp.lt.s32.totalorder %s1222_s23, 2 }
  0x21   : > { %s754_s6 = sshll.u32 %s236_s29, 3  ;;  %s1490_s0 = sld [smem:[#allocation18_spill]] }
  0x22   : > { %s240_s11 = scalar_lea.vmem [#allocation2], %s754_s6  ;;  %p915_p11 = pnand %p930_p7, %p56_p4 }
  0x23   : > { %s249_s12 = sshll.u32 %s240_s11, 4  ;;  %s237_s15 = scalar_lea.sflag [#allocation3], %s236_s29  ;;  %s250_s12 = int_to_ptr.vmem [resolvable:$true] %s249_s12 }
  0x25   : > { %258 = sbr.rel (%p1297_p3) target bundleno = 247 (0xf7), region = 32 }
  0x27   : > { %s245_s9 = scalar_lea.hbm %s1490_s0, %s755_s30 }
  0x28   : > { %s247_s10 = sshll.u32 %s245_s9, 4  ;;  %s248_s10 = int_to_ptr.hbm [resolvable:$true] %s247_s10 }
  0x29   : > { %917 = dma.hbm_to_vmem [thread:$0]  (!%p915_p11), %s248_s10, 128, %s250_s12, %s237_s15  }
  0x2a   : > { %s1350_s16 = sand.u32 1, %s1206_s19  }
  0x2b   : > { %s757_s14 = sshll.u32 %s1350_s16, 3  ;;  %s261_s7 = scalar_lea.sflag [#allocation3], %s1350_s16 }
  0x2c   : > { %s1354_s30 = scalar_lea.vmem [#allocation2], %s757_s14 }
  0x2d   : > { %1185 = dma.done.wait (%p1324_p13), %s261_s7, 128  }
  0x2e   : > { %1187 = vsyncadd (%p1324_p13), %s261_s7, 4294967168 }
  0x2f   : > { %1189 = dma.done.wait (%p61_p1), [#allocation6], 3120  }
  0x30   : > { %1191 = vsyncadd (%p61_p1), [#allocation6], 4294964176  ;;  %v849_v0 = vld [vmem:[#allocation5 + $0xa8] sm:$0xf]  ;;  %v889_v1 = vld [vmem:[#allocation5 + $0xb0] sm:$0xf0] }
  0x31   : > { %v888_v2 = vld [vmem:[#allocation5 + $0xac] sm:$0xf]  ;;  %v850_v3 = vor.u32 %v889_v1, %v849_v0  ;;  %v851_v4 = vld [vmem:[#allocation5 + $0xb4] sm:$0xf0]  ;;  %v857_v5 = vld [vmem:[#allocation5 + $0xb0] sm:$0xf] }
  0x32   : > { %v890_v6 = vld [vmem:[#allocation5 + $0xb8] sm:$0xf0]  ;;  %v854_v7 = vor.u32 %v888_v2, %v851_v4  ;;  %v837_v9 = vld [vmem:[#allocation5 + $0x90] sm:$0xf]  ;;  %v885_v11 = vld [vmem:[#allocation5 + $0x94] sm:$0xf] }
  0x33   : > { %v858_v8 = vor.u32 %v890_v6, %v857_v5  ;;  %v886_v10 = vld [vmem:[#allocation5 + $0x98] sm:$0xf0]  ;;  %482 = vmatpush.bf16.msra.mxu0 %v850_v3  ;;  %v839_v13 = vld [vmem:[#allocation5 + $0x9c] sm:$0xf0]  ;;  %v845_v14 = vld [vmem:[#allocation5 + $0x98] sm:$0xf] }
  0x34   : > { %v838_v12 = vor.u32 %v886_v10, %v837_v9  ;;  %v887_v15 = vld [vmem:[#allocation5 + $0xa0] sm:$0xf0]  ;;  %495 = vmatpush.bf16.msra.mxu1 %v854_v7  ;;  %v842_v16 = vor.u32 %v885_v11, %v839_v13  ;;  %v825_v18 = vld [vmem:[#allocation5 + $0x78] sm:$0xf]  ;;  %v882_v20 = vld [vmem:[#allocation5 + $0x7c] sm:$0xf] }
  0x35   : > { %508 = vmatpush.bf16.msra.mxu2 %v858_v8  ;;  %v846_v17 = vor.u32 %v887_v15, %v845_v14  ;;  %v883_v19 = vld [vmem:[#allocation5 + $0x80] sm:$0xf0]  ;;  %v827_v21 = vld [vmem:[#allocation5 + $0x84] sm:$0xf0]  ;;  %v833_v22 = vld [vmem:[#allocation5 + $0x80] sm:$0xf] }
  0x36   : > { %v884_v23 = vld [vmem:[#allocation5 + $0x88] sm:$0xf0]  ;;  %v826_v24 = vor.u32 %v883_v19, %v825_v18  ;;  %v830_v25 = vor.u32 %v882_v20, %v827_v21  ;;  %v813_v27 = vld [vmem:[#allocation5 + $0x60] sm:$0xf]  ;;  %v879_v29 = vld [vmem:[#allocation5 + $0x64] sm:$0xf] }
  0x37   : > { %483 = vmatpush.bf16.msra.mxu0 %v838_v12  ;;  %v834_v26 = vor.u32 %v884_v23, %v833_v22  ;;  %v880_v28 = vld [vmem:[#allocation5 + $0x68] sm:$0xf0]  ;;  %v815_v30 = vld [vmem:[#allocation5 + $0x6c] sm:$0xf0]  ;;  %v821_v31 = vld [vmem:[#allocation5 + $0x68] sm:$0xf] }
  0x38   : > { %496 = vmatpush.bf16.msra.mxu1 %v842_v16  ;;  %v881_v32 = vld [vmem:[#allocation5 + $0x70] sm:$0xf0]  ;;  %v814_v33 = vor.u32 %v880_v28, %v813_v27  ;;  %v818_v34 = vor.u32 %v879_v29, %v815_v30  ;;  %v801_v36 = vld [vmem:[#allocation5 + $0x48] sm:$0xf]  ;;  %v876_v38 = vld [vmem:[#allocation5 + $0x4c] sm:$0xf] }
  0x39   : > { %509 = vmatpush.bf16.msra.mxu2 %v846_v17  ;;  %v822_v35 = vor.u32 %v881_v32, %v821_v31  ;;  %v877_v37 = vld [vmem:[#allocation5 + $0x50] sm:$0xf0]  ;;  %v803_v39 = vld [vmem:[#allocation5 + $0x54] sm:$0xf0]  ;;  %v809_v40 = vld [vmem:[#allocation5 + $0x50] sm:$0xf] }
  0x3a   : > { %v878_v41 = vld [vmem:[#allocation5 + $0x58] sm:$0xf0]  ;;  %v802_v42 = vor.u32 %v877_v37, %v801_v36  ;;  %v806_v43 = vor.u32 %v876_v38, %v803_v39  ;;  %v789_v45 = vld [vmem:[#allocation5 + $0x30] sm:$0xf]  ;;  %v873_v47 = vld [vmem:[#allocation5 + $0x34] sm:$0xf] }
  0x3b   : > { %484 = vmatpush.bf16.msra.mxu0 %v826_v24  ;;  %v810_v44 = vor.u32 %v878_v41, %v809_v40  ;;  %v874_v46 = vld [vmem:[#allocation5 + $0x38] sm:$0xf0]  ;;  %v791_v48 = vld [vmem:[#allocation5 + $0x3c] sm:$0xf0]  ;;  %v797_v49 = vld [vmem:[#allocation5 + $0x38] sm:$0xf] }
  0x3c   : > { %497 = vmatpush.bf16.msra.mxu1 %v830_v25  ;;  %v875_v50 = vld [vmem:[#allocation5 + $0x40] sm:$0xf0]  ;;  %v790_v51 = vor.u32 %v874_v46, %v789_v45  ;;  %v794_v52 = vor.u32 %v873_v47, %v791_v48  ;;  %v777_v54 = vld [vmem:[#allocation5 + $0x18] sm:$0xf]  ;;  %v870_v56 = vld [vmem:[#allocation5 + $0x1c] sm:$0xf] }
  0x3d   : > { %510 = vmatpush.bf16.msra.mxu2 %v834_v26  ;;  %v798_v53 = vor.u32 %v875_v50, %v797_v49  ;;  %v871_v55 = vld [vmem:[#allocation5 + $0x20] sm:$0xf0]  ;;  %v779_v57 = vld [vmem:[#allocation5 + $0x24] sm:$0xf0]  ;;  %v785_v58 = vld [vmem:[#allocation5 + $0x20] sm:$0xf] }
  0x3e   : > { %v872_v59 = vld [vmem:[#allocation5 + $0x28] sm:$0xf0]  ;;  %v778_v60 = vor.u32 %v871_v55, %v777_v54  ;;  %v782_v61 = vor.u32 %v870_v56, %v779_v57  ;;  %v765_v63 = vld [vmem:[#allocation5] sm:$0xf]  ;;  %v867_v1 = vld [vmem:[#allocation5 + $0x4] sm:$0xf] }
  0x3f   : > { %485 = vmatpush.bf16.msra.mxu0 %v814_v33  ;;  %v786_v62 = vor.u32 %v872_v59, %v785_v58  ;;  %v868_v0 = vld [vmem:[#allocation5 + $0x8] sm:$0xf0]  ;;  %v767_v2 = vld [vmem:[#allocation5 + $0xc] sm:$0xf0]  ;;  %v773_v3 = vld [vmem:[#allocation5 + $0x8] sm:$0xf] }
  0x40   : > { %498 = vmatpush.bf16.msra.mxu1 %v818_v34  ;;  %v869_v4 = vld [vmem:[#allocation5 + $0x10] sm:$0xf0]  ;;  %v766_v5 = vor.u32 %v868_v0, %v765_v63  ;;  %v770_v7 = vor.u32 %v867_v1, %v767_v2  ;;  %s1366_s28 = sshll.u32 %s1350_s16, 2  ;;  %v346_v10 = vld [vmem:[#allocation7] sm:$0x7]  ;;  %s862_s14 = sshll.u32 %s1214_s21, 2 }
  0x41   : > { %511 = vmatpush.bf16.msra.mxu2 %v822_v35  ;;  %v312_v6 = vld [vmem:[%s1354_s30] sm:$0xff]  ;;  %v774_v8 = vor.u32 %v869_v4, %v773_v3  ;;  %v348_v11 = vperm.slane %v346_v10, 0  ;;  %s549_s6 = scalar_lea.hbm %s1475_s3, %s862_s14  ;;  %v349_v12 = vperm.slane %v346_v10, 1  ;;  %s564_s11 = scalar_lea.hbm %s1476_s4, %s862_s14  ;;  %v350_v19 = vperm.slane %v346_v10, 2 }
  0x42   : > { %v313_v9 = vpack.c.bf16 %v312_v6, %v312_v6  ;;  %s304_s12 = scalar_lea.vmem [#allocation9], %s1366_s28  ;;  %s297_s7 = scalar_lea.vmem [#allocation8], %s1366_s28 }
  0x43   : > { %486 = vmatpush.bf16.msra.mxu0 %v802_v42  ;;  %s1377_s15 = sshll.u32 %s304_s12, 4  ;;  %s1380_s30 = sshll.u32 %s297_s7, 4  ;;  %s552_s30 = int_to_ptr.vmem [resolvable:$true] %s1380_s30 }
  0x44   : > { %499 = vmatpush.bf16.msra.mxu1 %v806_v43  ;;  %1491 = sst [smem:[#allocation16_spill]] %s1377_s15  ;;  %s1382_s21 = sshll.u32 %s549_s6, 4  ;;  %s554_s21 = int_to_ptr.hbm [resolvable:$true] %s1382_s21 }
  0x45   : > { %512 = vmatpush.bf16.msra.mxu2 %v810_v44  ;;  %s1384_s17 = sshll.u32 %s564_s11, 4  ;;  %s579_s10 = scalar_lea.hbm %s1477_s5, %s862_s14 }
  0x46   : > { %1492 = sst [smem:[#allocation17_spill]] %s1384_s17  ;;  %s1482_s6 = scalar_lea.vmem [#allocation11], %s1366_s28 }
  0x47   : > { %487 = vmatpush.bf16.msra.mxu0 %v790_v51  ;;  %s1396_s8 = sshll.u32 %s1482_s6, 4  ;;  %s1398_s11 = sshll.u32 %s579_s10, 4  ;;  %s582_s8 = int_to_ptr.vmem [resolvable:$true] %s1396_s8  ;;  %s584_s11 = int_to_ptr.hbm [resolvable:$true] %s1398_s11 }
  0x48   : > { %500 = vmatpush.bf16.msra.mxu1 %v794_v52  ;;  %s528_s0 = scalar_lea.sflag [#allocation4], %s1350_s16  ;;  %s1090_s1 = sshra.s32 %s554_s21, 4  ;;  %s1091_s1 = int_to_ptr.hbm [resolvable:$true] %s1090_s1 }
  0x49   : > { %513 = vmatpush.bf16.msra.mxu2 %v798_v53  ;;  %s1092_s14 = scalar_lea.hbm %s1091_s1, 4  ;;  %s1096_s15 = scalar_lea.hbm %s1475_s3, 8 }
  0x4a   : > { %p1093_p1 = scmp.ne.s32.totalorder %s1091_s1, %s1092_s14  ;;  %p1097_p9 = scmp.lt.s32.totalorder %s1091_s1, %s1475_s3 }
  0x4b   : > { %488 = vmatpush.bf16.msra.mxu0 %v778_v60  ;;  %p1098_p10 = scmp.lt.s32.totalorder %s1096_s15, %s1092_s14 }
  0x4c   : > { %501 = vmatpush.bf16.msra.mxu1 %v782_v61  ;;  %p1094_p3 = pnand %p1093_p1, %p1328_p0 }
  0x4d   : > { %514 = vmatpush.bf16.msra.mxu2 %v786_v62  ;;  %p1099_p12 = por %p1098_p10, %p1097_p9 }
  0x4e   : > { %p1095_p8 = pneg %p1094_p3 }
  0x4f   : > { %489 = vmatpush.bf16.msra.mxu0 %v766_v5 }
  0x50   : > { %502 = vmatpush.bf16.msra.mxu1 %v770_v7  ;;  %p1100_p13 = pnand %p1099_p12, %p1095_p8 }
  0x51   : > { %515 = vmatpush.bf16.msra.mxu2 %v774_v8 }
  0x52   : > { %490 = vmatmul.bf16.vlgmr.msra.gmra.mxu0 %v313_v9 }
  0x53   : > { %503 = vmatmul.bf16.vlgmr.msra.gmra.mxu1 %v313_v9 }
  0x54   : > { %516 = vmatmul.bf16.vlgmr.msra.gmra.mxu2 %v313_v9 }
  0xcf   : > { %v491_v13 = vpop.f32.mrf.mxu0 }
  0xd0   : > { %v492_v14 = vadd.f32 %v491_v13, %v348_v11  ;;  %v504_v15 = vpop.f32.mrf.mxu1 }
  0xd1   : > { %v505_v16 = vadd.f32 %v504_v15, %v349_v12 }
  0xd2   : > { %v521_v17 = vpack.c.bf16 %v492_v14, %v492_v14 }
  0xd3   : > { %v523_v18 = vpack.c.bf16 %v505_v16, %v505_v16 }
  0xd4   : > { %522 = vst [vmem:[%s297_s7] sm:$0xf] %v521_v17 }
  0xd5   : > { %524 = vst [vmem:[%s304_s12] sm:$0xf] %v523_v18 }
  0xd6   : > { %1103 = shalt.err (!%p1100_p13)
}
  0xd7   : > { %s1493_s16 = sld [smem:[#allocation17_spill]]  ;;  %v517_v20 = vpop.f32.mrf.mxu2  ;;  %s1494_s12 = sand.u32 1, %s1289_s24  }
  0xd8   : > { %901 = dma.vmem_to_hbm [thread:$0]  (%p1328_p0), %s552_s30, 64, %s554_s21, %s528_s0  }
  0xd9   : > { %s1413_s10 = scalar_lea.sflag [#allocation10], %s1494_s12  ;;  %s1124_s17 = scalar_lea.hbm %s1476_s4, 8 }
  0xdd   : > { %s1495_s29 = int_to_ptr.hbm [resolvable:$true] %s1493_s16 }
  0xde   : > { %s1118_s9 = sshra.s32 %s1495_s29, 4  ;;  %s1119_s9 = int_to_ptr.hbm [resolvable:$true] %s1118_s9 }
  0xdf   : > { %s1120_s6 = scalar_lea.hbm %s1119_s9, 4  ;;  %p1125_p11 = scmp.lt.s32.totalorder %s1119_s9, %s1476_s4 }
  0xe0   : > { %p1121_p2 = scmp.ne.s32.totalorder %s1119_s9, %s1120_s6  ;;  %p1126_p1 = scmp.lt.s32.totalorder %s1124_s17, %s1120_s6 }
  0xe2   : > { %p1122_p4 = pnand %p1121_p2, %p1328_p0  ;;  %p1127_p3 = por %p1126_p1, %p1125_p11 }
  0xe4   : > { %p1123_p7 = pneg %p1122_p4 }
  0xe6   : > { %p1128_p8 = pnand %p1127_p3, %p1123_p7 }
  0xe8   : > { %1131 = shalt.err (!%p1128_p8)
}
  0xe9   : > { %s1496_s0 = smov %s1495_s29  ;;  %s1497_s24 = sld [smem:[#allocation16_spill]]  ;;  %v518_v21 = vadd.f32 %v517_v20, %v350_v19  ;;  %v493_v22 = vpop.f32.mrf.mxu0  ;;  %v506_v23 = vpop.f32.mrf.mxu1 }
  0xea   : > { %s1499_s21 = scalar_lea.vmem [#allocation11], %s1366_s28  ;;  %s1146_s6 = sshra.s32 %s584_s11, 4  ;;  %s1147_s6 = int_to_ptr.hbm [resolvable:$true] %s1146_s6 }
  0xeb   : > { %v525_v24 = vpack.c.bf16 %v518_v21, %v518_v21  ;;  %s1148_s12 = scalar_lea.hbm %s1147_s6, 4  ;;  %s1152_s9 = scalar_lea.hbm %s1477_s5, 8 }
  0xec   : > { %p1149_p9 = scmp.ne.s32.totalorder %s1147_s6, %s1148_s12  ;;  %p1153_p13 = scmp.lt.s32.totalorder %s1147_s6, %s1477_s5 }
  0xed   : > { %526 = vst [vmem:[%s1499_s21] sm:$0xf] %v525_v24  ;;  %p1154_p2 = scmp.lt.s32.totalorder %s1152_s9, %s1148_s12 }
  0xee   : > { %p1150_p10 = pnand %p1149_p9, %p1328_p0 }
  0xef   : > { %s1498_s30 = int_to_ptr.vmem [resolvable:$true] %s1497_s24  ;;  %p1155_p4 = por %p1154_p2, %p1153_p13 }
  0xf0   : > { %902 = dma.vmem_to_hbm [thread:$0]  (%p1328_p0), %s1498_s30, 64, %s1496_s0, %s1413_s10  }
  0xf1   : > { %p1151_p12 = pneg %p1150_p10 }
  0xf3   : > { %p1156_p7 = pnand %p1155_p4, %p1151_p12 }
  0xf5   : > { %1159 = shalt.err (!%p1156_p7)
}
  0xf6   : > { %903 = dma.vmem_to_hbm [thread:$0]  (%p1328_p0), %s582_s8, 64, %s584_s11, %s1413_s10   ;;  %v519_v25 = vpop.f32.mrf.mxu2 }
  0xf7 PF: > { %s595_s28 = sand.u32 1, %s1202_s18   ;;  %p919_p11 = pnand %p753_p6, %p1337_p5 }
  0xf8   : > { %s596_s17 = scalar_lea.sflag [#allocation4], %s595_s28 }
  0xf9   : > { %p920_p1 = pneg %p919_p11 }
  0xfb   : > { %1193 = dma.done.wait (%p920_p1), %s596_s17, 64  }
  0xfc   : > { %1195 = vsyncadd (%p920_p1), %s596_s17, 4294967232  ;;  %s1500_s14 = sadd.s32 4294967294, %s1222_s23  }
  0xfd   : > { %s605_s7 = sand.u32 1, %s1500_s14  }
  0xfe   : > { %s606_s0 = scalar_lea.sflag [#allocation10], %s605_s7 }
  0xff   : > { %1197 = dma.done.wait (%p920_p1), %s606_s0, 128  }
 0x100   : > { %1199 = vsyncadd (%p920_p1), %s606_s0, 4294967168  ;;  %s26_s23 = sadd.s32 1, %s1222_s23   ;;  %s1501_s18 = smov %s1206_s19 }
 0x101   : > { %p23_p0 = scmp.ge.s32.totalorder %s26_s23, 4   ;;  %s1502_s19 = smov %s1210_s20 }
 0x102   : > { %s1503_s20 = smov %s1335_s26  ;;  %s1504_s21 = smov %s1218_s22 }
 0x103   : > { %s1505_s22 = smov %s1507_s13  ;;  %25 = sbr.rel (!%p23_p0) target bundleno = 12 (0xc), region = 117 }
 0x108   :  { %622 = vsyncpa [#allocation3], 1 }
 0x109   :  { %624 = vsyncpa [#allocation3 + $0x1], 1 }
 0x10a   :  { %625 = vsyncpa [#allocation6], 1 }
 0x10b   :  { %626 = vsyncpa [#allocation4], 1 }
 0x10c   :  { %628 = vsyncpa [#allocation4 + $0x1], 1 }
 0x10d   :  { %629 = vsyncpa [#allocation10], 1 }
 0x10e   :  { %631 = vsyncpa [#allocation10 + $0x1], 1 }

</bundles_post_ra>
